<compile_context>
chip_gen: v5e
topology: v5e:2x2
jax: 0.10.0
libtpu: 0.0.40
codegen_flags: <defaults>
</compile_context>

<pallas_src>
import jax
import jax.numpy as jnp
from jax.experimental import pallas as pl
from jax.experimental.pallas import tpu as pltpu


def _normalization_kernel(p_ref, x_ref, o_ref):
    # p_ref: (rows_tile, 2) f32 — column 0 = mean, column 1 = 1/sigma per row.
    # x_ref / o_ref: (rows_tile, lanes_tile) lane-dense data tile.
    mean = p_ref[:, 0:1]
    inv_sigma = p_ref[:, 1:2]
    x = x_ref[...].astype(jnp.float32)
    o_ref[...] = ((x - mean) * inv_sigma).astype(o_ref.dtype)


def _hw_budgets():
    """Return (per-buffer tile byte budget, scoped-VMEM limit) for the local TPU."""
    kind = ""
    try:
        kind = jax.devices()[0].device_kind.lower()
    except Exception:
        pass
    if "v5 lite" in kind or "v5e" in kind or "v5lite" in kind:
        # v5e: ~0.8 TB/s HBM, 16 MiB default scoped VMEM.  2 MiB tiles already
        # amortize the per-step overhead; raise the scoped limit for headroom only.
        return 2 << 20, 32 << 20
    if "7" in kind:
        # v7x: 64 MiB physical VMEM, ~3.2 TB/s HBM per TC -> bigger tiles to
        # amortize the ~0.35 us per-step overhead; stay well under 64 MiB
        # (2 x (in + out) tiles ~ 24 MiB, limit 40 MiB).
        return 6 << 20, 40 << 20
    if "v6" in kind:
        return 4 << 20, 32 << 20
    return 2 << 20, 32 << 20  # unknown generation: conservative


def _choose_tiles(rows, lanes, itemsize, target_bytes, min_steps=4):
    """Pick (rows_tile, lanes_tile) obeying the (8, 128) rule and the byte budget."""
    sub = max(8, 32 // itemsize)  # native sublane packing: 8 f32 / 16 bf16 / 32 int8
    total = rows * lanes * itemsize
    if total <= (1 << 20):
        return rows, lanes  # small input: one full block is fine

    # Lane (last) dim: full extent if modest, else the largest multiple of 128
    # that evenly divides `lanes` (keeps every store an unmasked lane-dense vst).
    LANE_CAP = 8192
    if lanes <= LANE_CAP:
        lanes_tile = lanes
    else:
        lanes_tile = 0
        for cand in range(LANE_CAP - LANE_CAP % 128, 127, -128):
            if lanes % cand == 0:
                lanes_tile = cand
                break
        if lanes_tile == 0:        # lanes not divisible by 128 at all
            lanes_tile = LANE_CAP  # masked trailing lane block (correct, rare)
    lane_blocks = pl.cdiv(lanes, lanes_tile)

    # Row (sublane) dim: fill the byte budget, rounded to the packing factor.
    rt = max(1, target_bytes // (lanes_tile * itemsize))
    rt = max(sub, (rt // sub) * sub)
    rows_tile = min(rt, rows)

    # Avoid the degenerate 1-block grid: keep >= min_steps grid steps so the
    # pipeline overlaps DMA/compute and v7x megacore has >= 2 parallel blocks.
    if lane_blocks * pl.cdiv(rows, rows_tile) < min_steps:
        want = pl.cdiv(rows, min_steps)
        want = max(sub, ((want + sub - 1) // sub) * sub)
        rows_tile = min(rows_tile, want)
    if rows_tile >= rows:
        rows_tile = rows
    return rows_tile, lanes_tile


def normalization_forward(x, mean, sigma, *, donate_x=False, tile_override=None):
    """(x - mean) / sigma with per-channel mean/sigma, x in NCHW layout."""
    N, C, H, W = x.shape
    rows, lanes = N * C, H * W

    # Per-row f32 params: col 0 = mean[c], col 1 = 1/sigma[c]  (row r -> c = r % C).
    mean_f32 = jnp.broadcast_to(jnp.asarray(mean, jnp.float32).reshape(-1), (C,))
    sigma_f32 = jnp.broadcast_to(jnp.asarray(sigma, jnp.float32).reshape(-1), (C,))
    params = jnp.stack([mean_f32, 1.0 / sigma_f32], axis=-1)  # (C, 2)
    params = jnp.tile(params, (N, 1))                         # (rows, 2)

    x2 = x.reshape(rows, lanes)  # contiguous NCHW -> free view
    itemsize = jnp.dtype(x.dtype).itemsize
    target_bytes, vmem_limit = _hw_budgets()
    if tile_override is not None:
        rows_tile, lanes_tile = tile_override
    else:
        rows_tile, lanes_tile = _choose_tiles(rows, lanes, itemsize, target_bytes)
    grid = (pl.cdiv(rows, rows_tile), pl.cdiv(lanes, lanes_tile))

    out2 = pl.pallas_call(
        _normalization_kernel,
        out_shape=jax.ShapeDtypeStruct((rows, lanes), x.dtype),
        grid=grid,
        in_specs=[
            pl.BlockSpec((rows_tile, 2), lambda i, j: (i, 0)),            # [mean, 1/sigma]
            pl.BlockSpec((rows_tile, lanes_tile), lambda i, j: (i, j)),   # x
        ],
        out_specs=pl.BlockSpec((rows_tile, lanes_tile), lambda i, j: (i, j)),
        # When the caller no longer needs x, reuse its HBM buffer for the output.
        input_output_aliases=({1: 0} if donate_x else {}),
        compiler_params=pltpu.CompilerParams(
            dimension_semantics=("parallel", "parallel"),
            vmem_limit_bytes=vmem_limit,
        ),
    )(params, x2)
    # TODO(synk): the only remaining >10% lever is fusing this normalization into
    # its consumer (first conv of the JPEG-defense net); standalone it is already
    # at the HBM roofline (1 read + 1 write per element).
    return out2.reshape(N, C, H, W)


if __name__ == "__main__":
    key = jax.random.PRNGKey(0)

    # Case 1: default tiling (small input -> single full block).
    N, C, H, W = 2, 4, 16, 16
    x = jax.random.normal(key, (N, C, H, W), dtype=jnp.float32)
    mean = jnp.array([0.485, 0.456, 0.406, 0.5], dtype=jnp.float32)
    sigma = jnp.array([0.229, 0.224, 0.225, 0.25], dtype=jnp.float32)
    ref = (x - mean[None, :, None, None]) / sigma[None, :, None, None]

    out = jax.block_until_ready(normalization_forward(x, mean, sigma))
    assert out.shape == x.shape and out.dtype == x.dtype
    assert jnp.allclose(out, ref, atol=1e-5, rtol=1e-5)

    # Case 2: force a multi-block grid (exercises the pipelined / multi-step path).
    out_tiled = jax.block_until_ready(
        normalization_forward(x, mean, sigma, tile_override=(8, 128)))
    assert jnp.allclose(out_tiled, ref, atol=1e-5, rtol=1e-5)

    # Case 3: lanes (H*W) not a multiple of 128 -> full-extent lane block path.
    x3 = jax.random.normal(jax.random.PRNGKey(1), (2, 3, 10, 10), dtype=jnp.float32)
    m3 = jnp.array([0.485, 0.456, 0.406], dtype=jnp.float32)
    s3 = jnp.array([0.229, 0.224, 0.225], dtype=jnp.float32)
    ref3 = (x3 - m3[None, :, None, None]) / s3[None, :, None, None]
    out3 = jax.block_until_ready(normalization_forward(x3, m3, s3))
    assert jnp.allclose(out3, ref3, atol=1e-5, rtol=1e-5)

    print("KERNEL_OK")
</pallas_src>

<mosaic_0001>
module attributes {stable_mosaic.version = 11 : i64} {
  func.func @_normalization_kernel(%arg0: i32, %arg1: i32, %arg2: memref<8x2xf32, #tpu.memory_space<vmem>>, %arg3: memref<8x256xf32, #tpu.memory_space<vmem>>, %arg4: memref<8x256xf32, #tpu.memory_space<vmem>>) attributes {dimension_semantics = [#tpu.dimension_semantics<parallel>, #tpu.dimension_semantics<parallel>], iteration_bounds = array<i64: 1, 1>, scalar_prefetch = 0 : i64, scratch_operands = 0 : i64, tpu.core_type = #tpu.core_type<tc>, window_params = [{transform_indices = @transform_0, window_bounds = array<i64: 8, 2>}, {transform_indices = @transform_1, window_bounds = array<i64: 8, 256>}, {transform_indices = @transform_2, window_bounds = array<i64: 8, 256>}]} {
    %c0 = arith.constant 0 : index
    %c0_0 = arith.constant 0 : index
    %0 = vector.load %arg2[%c0, %c0_0] : memref<8x2xf32, #tpu.memory_space<vmem>>, vector<8x1xf32>
    %c0_1 = arith.constant 0 : index
    %c1 = arith.constant 1 : index
    %1 = vector.load %arg2[%c0_1, %c1] : memref<8x2xf32, #tpu.memory_space<vmem>>, vector<8x1xf32>
    %c0_2 = arith.constant 0 : index
    %c0_3 = arith.constant 0 : index
    %2 = vector.load %arg3[%c0_2, %c0_3] : memref<8x256xf32, #tpu.memory_space<vmem>>, vector<8x256xf32>
    %3 = vector.broadcast %0 : vector<8x1xf32> to vector<8x256xf32>
    %4 = arith.subf %2, %3 : vector<8x256xf32>
    %5 = vector.broadcast %1 : vector<8x1xf32> to vector<8x256xf32>
    %6 = arith.mulf %4, %5 : vector<8x256xf32>
    %c0_4 = arith.constant 0 : index
    %c0_5 = arith.constant 0 : index
    %7 = vector.load %arg4[%c0_4, %c0_5] : memref<8x256xf32, #tpu.memory_space<vmem>>, vector<8x256xf32>
    tpu.vector_store %arg4[%c0_4, %c0_5], %6 {strides = array<i32>} : memref<8x256xf32, #tpu.memory_space<vmem>>, vector<8x256xf32>,
    return
  }
  func.func @transform_0(%arg0: i32, %arg1: i32) -> (i32, i32) {
    %c0_i32 = arith.constant 0 : i32
    %c0_i32_0 = arith.constant 0 : i32
    return %arg0, %c0_i32 : i32, i32
  }
  func.func @transform_1(%arg0: i32, %arg1: i32) -> (i32, i32) {
    %c0_i32 = arith.constant 0 : i32
    return %arg0, %arg1 : i32, i32
  }
  func.func @transform_2(%arg0: i32, %arg1: i32) -> (i32, i32) {
    %c0_i32 = arith.constant 0 : i32
    return %arg0, %arg1 : i32, i32
  }
}

</mosaic_0001>

<bundles_post_ra>
// kernel: tpu_custom_call.1
= control target key start
LH: loop header
LB: loop body
LE: loop exit
PB: predicated region body
PF: predicated region fallthrough
CT: control target
= control target key end

     0   :  { %7 = vsyncpa [#allocation3], 0  ;;  %s147_s0 = inlined_call_operand.vmem [shape: f32[8,2], index: 0, kind: input, shape index: {}]   ;;  %s148_s1 = inlined_call_operand.hbm [shape: f32[8,256], index: 1, kind: input, shape index: {}]   ;;  %s149_s2 = inlined_call_operand.hbm [shape: f32[8,256], index: 2, kind: output, shape index: {}]  }
   0x1   :  { %8 = vsyncpa [#allocation4], 0  ;;  %s16_s11 = sshll.u32 %s148_s1, 4  ;;  %s119_s12 = smov [#allocation2]   ;;  %s17_s11 = int_to_ptr.hbm [resolvable:$true] %s16_s11 }
   0x2   :  { %s18_s13 = sshll.u32 %s119_s12, 4  ;;  %s19_s13 = int_to_ptr.vmem [resolvable:$true] %s18_s13 }
   0x3   :  { %21 = dma.hbm_to_vmem [thread:$0]  %s17_s11, 256, %s19_s13, [#allocation3]  }
   0x4   :  { %115 = dma.done.wait [#allocation3], 256  }
   0x5   :  { %116 = vsyncadd [#allocation3], 4294967040  ;;  %v120_v0 = vmov 0   ;;  %v26_v1 = vld [vmem:[%s147_s0] sm:$0xff]  ;;  %v121_v2 = vmov 1   ;;  %v28_v5 = vld [vmem:[#allocation2 + $0x8] sm:$0xff] }
   0x6   :  { %65 = vset.pattern.permute.xlu0 %v120_v0  ;;  %v27_v4 = vld [vmem:[#allocation2] sm:$0xff]  ;;  %s122_s1 = smov [#allocation5]   ;;  %s51_s19 = sshll.u32 %s149_s2, 4  ;;  %s52_s19 = int_to_ptr.hbm [resolvable:$true] %s51_s19 }
   0x7   :  { %31 = vperm.xlu0 %65, %v26_v1   ;;  %s49_s16 = sshll.u32 %s122_s1, 4  ;;  %s50_s16 = int_to_ptr.vmem [resolvable:$true] %s49_s16 }
   0xf   :  { %66 = vset.pattern.permute.xlu0 %v121_v2 }
  0x10   :  { %37 = vperm.xlu0 %66, %v26_v1  }
  0x79   :  { %v32_v3 = vpop.permute.xlu0 %31 }
  0x7a   :  { %v34_v6 = vsub.f32 %v27_v4, %v32_v3  ;;  %v35_v7 = vsub.f32 %v28_v5, %v32_v3 }
  0x82   :  { %v38_v8 = vpop.permute.xlu0 %37 }
  0x83   :  { %v40_v9 = vmul.f32 %v38_v8, %v34_v6  ;;  %v41_v10 = vmul.f32 %v38_v8, %v35_v7 }
  0x85   :  { %42 = vst [vmem:[#allocation5] sm:$0xff] %v40_v9 }
  0x86   :  { %43 = vst [vmem:[#allocation5 + $0x8] sm:$0xff] %v41_v10 }
  0x87   :  { %54 = dma.vmem_to_hbm [thread:$0]  %s50_s16, 256, %s52_s19, [#allocation4]  }
  0x88   :  { %117 = dma.done.wait [#allocation4], 256  }
  0x89   :  { %118 = vsyncadd [#allocation4], 4294967040 }
  0x8a   :  { %59 = vsyncpa [#allocation3], 1 }
  0x8b   :  { %60 = vsyncpa [#allocation4], 1 }

</bundles_post_ra>
